<compile_context>
chip_gen: v5e
topology: v5e:2x2
jax: 0.10.0
libtpu: 0.0.40
codegen_flags: <defaults>
</compile_context>

<pallas_src>
import functools

import jax
import jax.numpy as jnp
from jax.experimental import pallas as pl
from jax.experimental.pallas import tpu as pltpu

P = 8  # rows packed per lane-dense row (8 rows x 16 f32 outputs = 128 lanes)


def _round_up(n, m):
    return (n + m - 1) // m * m


def _itemmlp_kernel(x_ref, w1_ref, b1_ref, w2_ref, b2_ref, o_ref):
    # Hidden layer on packed rows: (tile/8, 8F) @ (8F, 8H) -> f32 accumulator.
    h = jnp.dot(x_ref[...], w1_ref[...], preferred_element_type=jnp.float32)
    h = h + b1_ref[...]                      # (tile/8, 8H) + (1, 8H)
    # LeakyReLU, PyTorch default negative_slope = 0.01 (elementwise, packing-safe).
    h = jnp.where(h > 0, h, 0.01 * h)
    # Output layer: (tile/8, 8H) @ (8H, 8O) -> (tile/8, 8O) lane-dense store.
    out = jnp.dot(h.astype(w2_ref.dtype), w2_ref[...],
                  preferred_element_type=jnp.float32)
    o_ref[...] = (out + b2_ref[...]).astype(o_ref.dtype)


@functools.partial(jax.jit, static_argnames=("tile_n",))
def item_mlp_forward(x, w1, b1, w2, b2, *, tile_n=4096):
    """x: (N, F) f32.  w1: (F, H), b1: (1, H), w2: (H, O), b2: (1, O), all f32.

    Weights are stored pre-transposed as (in_features, out_features) so the
    kernel computes x @ W + b, matching nn.Linear.
    """
    N, F = x.shape
    H = w1.shape[1]
    O = w2.shape[1]

    # bf16 for the heavy HBM traffic / MXU inputs; biases stay f32.
    xb = x.astype(jnp.bfloat16)

    # Block-diagonal packed weights: process P rows of x per packed row.
    eye = jnp.eye(P, dtype=jnp.float32)
    w1_blk = jnp.kron(eye, w1).astype(jnp.bfloat16)   # (P*F, P*H)
    w2_blk = jnp.kron(eye, w2).astype(jnp.bfloat16)   # (P*H, P*O)
    b1_tiled = jnp.tile(b1, (1, P))                   # (1, P*H) f32
    b2_tiled = jnp.tile(b2, (1, P))                   # (1, P*O) f32

    # Row tile: large (amortize ~0.35us/step), multiple of 128 (so the packed
    # first block dim is a multiple of 16 for bf16), capped at ~N/2 so v7x's
    # two TensorCores both get work for moderate N.
    tile = max(128, min(_round_up(tile_n, 128), _round_up(pl.cdiv(N, 2), 128)))
    n_pad = _round_up(N, tile)
    if n_pad != N:
        xb = jnp.pad(xb, ((0, n_pad - N), (0, 0)))

    x_packed = xb.reshape(n_pad // P, P * F)          # free row-major view
    rows_blk = tile // P
    grid = (n_pad // tile,)

    out_packed = pl.pallas_call(
        _itemmlp_kernel,
        out_shape=jax.ShapeDtypeStruct((n_pad // P, P * O), jnp.float32),
        grid_spec=pl.GridSpec(
            grid=grid,
            in_specs=[
                pl.BlockSpec((rows_blk, P * F), lambda i: (i, 0)),   # packed x tile
                pl.BlockSpec((P * F, P * H), lambda i: (0, 0)),      # W1 block-diag (resident)
                pl.BlockSpec((1, P * H), lambda i: (0, 0)),          # b1 tiled
                pl.BlockSpec((P * H, P * O), lambda i: (0, 0)),      # W2 block-diag (resident)
                pl.BlockSpec((1, P * O), lambda i: (0, 0)),          # b2 tiled
            ],
            out_specs=pl.BlockSpec((rows_blk, P * O), lambda i: (i, 0)),
        ),
        compiler_params=pltpu.CompilerParams(
            dimension_semantics=("parallel",)),
    )(x_packed, w1_blk, b1_tiled, w2_blk, b2_tiled)

    out = out_packed.reshape(n_pad, O)[:N]            # free unpack + crop padding
    return out.astype(x.dtype)


def init_params(key, in_features, hidden, out_features):
    """Deterministic init mimicking nn.Linear default (uniform +-1/sqrt(fan_in))."""
    k1, k2, k3, k4 = jax.random.split(key, 4)
    lim1 = 1.0 / (in_features ** 0.5)
    lim2 = 1.0 / (hidden ** 0.5)
    # stored already transposed: (in, out)
    w1 = jax.random.uniform(k1, (in_features, hidden), jnp.float32, -lim1, lim1)
    b1 = jax.random.uniform(k2, (1, hidden), jnp.float32, -lim1, lim1)
    w2 = jax.random.uniform(k3, (hidden, out_features), jnp.float32, -lim2, lim2)
    b2 = jax.random.uniform(k4, (1, out_features), jnp.float32, -lim2, lim2)
    return w1, b1, w2, b2


if __name__ == "__main__":
    # Small shapes consistent with the module's forward: (batch, item_hidden_size).
    # N=256 exercises a multi-step grid (tile gets capped to 128 -> 2 steps).
    N, H, O = 256, 32, 16
    key = jax.random.PRNGKey(0)
    kx, kp = jax.random.split(key)
    x = jax.random.normal(kx, (N, H), jnp.float32)
    w1, b1, w2, b2 = init_params(kp, H, H, O)

    out = item_mlp_forward(x, w1, b1, w2, b2)
    out = jax.block_until_ready(out)

    # Pure-JAX reference (Linear -> LeakyReLU(0.01) -> Linear) with the same
    # bf16 input/weight rounding the kernel uses (f32 accumulation).
    xb = x.astype(jnp.bfloat16).astype(jnp.float32)
    w1b = w1.astype(jnp.bfloat16).astype(jnp.float32)
    w2b = w2.astype(jnp.bfloat16).astype(jnp.float32)
    h_ref = xb @ w1b + b1
    h_ref = jnp.where(h_ref > 0, h_ref, 0.01 * h_ref)
    ref = h_ref.astype(jnp.bfloat16).astype(jnp.float32) @ w2b + b2

    assert out.shape == (N, O)
    assert jnp.allclose(out, ref, atol=1e-2, rtol=1e-2)

    print("KERNEL_OK")
</pallas_src>

<mosaic_0001>
module attributes {stable_mosaic.version = 11 : i64} {
  func.func @_itemmlp_kernel(%arg0: i32, %arg1: memref<16x256xbf16, #tpu.memory_space<vmem>>, %arg2: memref<256x256xbf16, #tpu.memory_space<vmem>>, %arg3: memref<1x256xf32, #tpu.memory_space<vmem>>, %arg4: memref<256x128xbf16, #tpu.memory_space<vmem>>, %arg5: memref<1x128xf32, #tpu.memory_space<vmem>>, %arg6: memref<16x128xf32, #tpu.memory_space<vmem>>) attributes {dimension_semantics = [#tpu.dimension_semantics<parallel>], iteration_bounds = array<i64: 2>, scalar_prefetch = 0 : i64, scratch_operands = 0 : i64, tpu.core_type = #tpu.core_type<tc>, window_params = [{transform_indices = @transform_0, window_bounds = array<i64: 16, 256>}, {pipeline_mode = #tpu.pipeline_mode<synchronous>, transform_indices = @transform_1, window_bounds = array<i64: 256, 256>}, {pipeline_mode = #tpu.pipeline_mode<synchronous>, transform_indices = @transform_2, window_bounds = array<i64: 1, 256>}, {pipeline_mode = #tpu.pipeline_mode<synchronous>, transform_indices = @transform_3, window_bounds = array<i64: 256, 128>}, {pipeline_mode = #tpu.pipeline_mode<synchronous>, transform_indices = @transform_4, window_bounds = array<i64: 1, 128>}, {transform_indices = @transform_5, window_bounds = array<i64: 16, 128>}]} {
    %c0 = arith.constant 0 : index
    %c0_0 = arith.constant 0 : index
    %0 = vector.load %arg1[%c0, %c0_0] : memref<16x256xbf16, #tpu.memory_space<vmem>>, vector<16x256xbf16>
    %c0_1 = arith.constant 0 : index
    %c0_2 = arith.constant 0 : index
    %1 = vector.load %arg2[%c0_1, %c0_2] : memref<256x256xbf16, #tpu.memory_space<vmem>>, vector<256x256xbf16>
    %cst = arith.constant dense<0.000000e+00> : vector<16x256xf32>
    %2 = tpu.matmul %0, %1, %cst {dimension_numbers = #tpu.dot_dimension_numbers<[1], [0], [0], [1], [0, 0, 1, 1], [], []>} : vector<16x256xbf16>, vector<256x256xbf16>, vector<16x256xf32> -> vector<16x256xf32>
    %c0_3 = arith.constant 0 : index
    %c0_4 = arith.constant 0 : index
    %3 = vector.load %arg3[%c0_3, %c0_4] : memref<1x256xf32, #tpu.memory_space<vmem>>, vector<1x256xf32>
    %4 = vector.broadcast %3 : vector<1x256xf32> to vector<16x256xf32>
    %5 = arith.addf %2, %4 : vector<16x256xf32>
    %cst_5 = arith.constant 0.000000e+00 : f32
    %6 = vector.broadcast %cst_5 : f32 to vector<16x256xf32>
    %7 = arith.cmpf ogt, %5, %6 : vector<16x256xf32>
    %cst_6 = arith.constant 0.00999999977 : f32
    %8 = vector.broadcast %cst_6 : f32 to vector<16x256xf32>
    %9 = arith.mulf %8, %5 : vector<16x256xf32>
    %10 = arith.select %7, %5, %9 : vector<16x256xi1>, vector<16x256xf32>
    %11 = arith.truncf %10 : vector<16x256xf32> to vector<16x256xbf16>
    %c0_7 = arith.constant 0 : index
    %c0_8 = arith.constant 0 : index
    %12 = vector.load %arg4[%c0_7, %c0_8] : memref<256x128xbf16, #tpu.memory_space<vmem>>, vector<256x128xbf16>
    %cst_9 = arith.constant dense<0.000000e+00> : vector<16x128xf32>
    %13 = tpu.matmul %11, %12, %cst_9 {dimension_numbers = #tpu.dot_dimension_numbers<[1], [0], [0], [1], [0, 0, 1, 1], [], []>} : vector<16x256xbf16>, vector<256x128xbf16>, vector<16x128xf32> -> vector<16x128xf32>
    %c0_10 = arith.constant 0 : index
    %c0_11 = arith.constant 0 : index
    %14 = vector.load %arg5[%c0_10, %c0_11] : memref<1x128xf32, #tpu.memory_space<vmem>>, vector<1x128xf32>
    %15 = vector.broadcast %14 : vector<1x128xf32> to vector<16x128xf32>
    %16 = arith.addf %13, %15 : vector<16x128xf32>
    %c0_12 = arith.constant 0 : index
    %c0_13 = arith.constant 0 : index
    %17 = vector.load %arg6[%c0_12, %c0_13] : memref<16x128xf32, #tpu.memory_space<vmem>>, vector<16x128xf32>
    tpu.vector_store %arg6[%c0_12, %c0_13], %16 {strides = array<i32>} : memref<16x128xf32, #tpu.memory_space<vmem>>, vector<16x128xf32>,
    return
  }
  func.func @transform_0(%arg0: i32) -> (i32, i32) {
    %c0_i32 = arith.constant 0 : i32
    %c0_i32_0 = arith.constant 0 : i32
    return %arg0, %c0_i32 : i32, i32
  }
  func.func @transform_1(%arg0: i32) -> (i32, i32) {
    %c0_i32 = arith.constant 0 : i32
    %c0_i32_0 = arith.constant 0 : i32
    %c0_i32_1 = arith.constant 0 : i32
    return %c0_i32, %c0_i32_0 : i32, i32
  }
  func.func @transform_2(%arg0: i32) -> (i32, i32) {
    %c0_i32 = arith.constant 0 : i32
    %c0_i32_0 = arith.constant 0 : i32
    %c0_i32_1 = arith.constant 0 : i32
    return %c0_i32, %c0_i32_0 : i32, i32
  }
  func.func @transform_3(%arg0: i32) -> (i32, i32) {
    %c0_i32 = arith.constant 0 : i32
    %c0_i32_0 = arith.constant 0 : i32
    %c0_i32_1 = arith.constant 0 : i32
    return %c0_i32, %c0_i32_0 : i32, i32
  }
  func.func @transform_4(%arg0: i32) -> (i32, i32) {
    %c0_i32 = arith.constant 0 : i32
    %c0_i32_0 = arith.constant 0 : i32
    %c0_i32_1 = arith.constant 0 : i32
    return %c0_i32, %c0_i32_0 : i32, i32
  }
  func.func @transform_5(%arg0: i32) -> (i32, i32) {
    %c0_i32 = arith.constant 0 : i32
    %c0_i32_0 = arith.constant 0 : i32
    return %arg0, %c0_i32 : i32, i32
  }
}

</mosaic_0001>

<bundles_post_ra>
// kernel: item_mlp_forward.1
= control target key start
LH: loop header
LB: loop body
LE: loop exit
PB: predicated region body
PF: predicated region fallthrough
CT: control target
= control target key end

     0   :  { %s1039_s18 = smov 0   ;;  %s1311_s0 = inlined_call_operand.vmem [shape: bf16[32,256], index: 0, kind: input, shape index: {}]   ;;  %s1312_s1 = inlined_call_operand.vmem [shape: bf16[256,256], index: 1, kind: input, shape index: {}]   ;;  %s1313_s2 = inlined_call_operand.vmem [shape: f32[1,256], index: 2, kind: input, shape index: {}]   ;;  %s1314_s3 = inlined_call_operand.vmem [shape: bf16[256,128], index: 3, kind: input, shape index: {}]   ;;  %s1315_s4 = inlined_call_operand.vmem [shape: f32[1,128], index: 4, kind: input, shape index: {}]   ;;  %s1316_s5 = inlined_call_operand.vmem [shape: f32[32,128], index: 5, kind: output, shape index: {}]  }
   0x1 LB: > { %s729_s19 = sadd.s32 4294967295, %s1007_s18   ;;  %p733_p0 = scmp.ge.s32.totalorder %s1007_s18, 1  ;;  %s1007_s18 = sphi %s1039_s18, %s15_s18  }
   0x2   : > { %p189_p1 = scmp.lt.s32.totalorder %s1007_s18, 3 }
   0x4   : > { %p190_p2 = pnand %p733_p0, %p189_p1 }
   0x5   : > { %s734_s11 = sshll.u32 (!%p190_p2), %s729_s19, 1 }
   0x6   : > { %193 = sbr.rel (%p190_p2) target bundleno = 333 (0x14d), region = 40  ;;  %p219_p3 = scmp.lt.s32.totalorder (!%p190_p2), %s734_s11, 3 }
   0xb   : > { %v805_v0 = vld [vmem:[%s1312_s1 + $0x70] sm:$0xf]  ;;  %v959_v1 = vld [vmem:[%s1312_s1 + $0x74] sm:$0xf0]  ;;  %v958_v5 = vld [vmem:[%s1312_s1 + $0x74] sm:$0xf] }
   0xc   : > { %v869_v2 = vld [vmem:[%s1312_s1 + $0xf0] sm:$0xf]  ;;  %v806_v3 = vor.u32 %v959_v1, %v805_v0  ;;  %v975_v4 = vld [vmem:[%s1312_s1 + $0xf4] sm:$0xf0]  ;;  %v807_v6 = vld [vmem:[%s1312_s1 + $0x78] sm:$0xf0] }
   0xd   : > { %v870_v7 = vor.u32 %v975_v4, %v869_v2  ;;  %v810_v8 = vor.u32 %v958_v5, %v807_v6  ;;  %v974_v9 = vld [vmem:[%s1312_s1 + $0xf4] sm:$0xf]  ;;  %v871_v10 = vld [vmem:[%s1312_s1 + $0xf8] sm:$0xf0]  ;;  %v797_v11 = vld [vmem:[%s1312_s1 + $0x60] sm:$0xf] }
   0xe   : > { %441 = vmatpush.bf16.msra.mxu0 %v806_v3  ;;  %v874_v12 = vor.u32 %v974_v9, %v871_v10  ;;  %v957_v13 = vld [vmem:[%s1312_s1 + $0x64] sm:$0xf0]  ;;  %v861_v14 = vld [vmem:[%s1312_s1 + $0xe0] sm:$0xf]  ;;  %v956_v18 = vld [vmem:[%s1312_s1 + $0x64] sm:$0xf] }
   0xf   : > { %v973_v15 = vld [vmem:[%s1312_s1 + $0xe4] sm:$0xf0]  ;;  %455 = vmatpush.bf16.msra.mxu1 %v870_v7  ;;  %469 = vmatpush.bf16.msra.mxu2 %v810_v8  ;;  %v798_v16 = vor.u32 %v957_v13, %v797_v11  ;;  %v799_v19 = vld [vmem:[%s1312_s1 + $0x68] sm:$0xf0]  ;;  %v972_v20 = vld [vmem:[%s1312_s1 + $0xe4] sm:$0xf] }
  0x10   : > { %v862_v17 = vor.u32 %v973_v15, %v861_v14  ;;  %483 = vmatpush.bf16.msra.mxu3 %v874_v12  ;;  %v802_v21 = vor.u32 %v956_v18, %v799_v19  ;;  %v863_v22 = vld [vmem:[%s1312_s1 + $0xe8] sm:$0xf0]  ;;  %v789_v23 = vld [vmem:[%s1312_s1 + $0x50] sm:$0xf]  ;;  %v955_v24 = vld [vmem:[%s1312_s1 + $0x54] sm:$0xf0] }
  0x11   : > { %v866_v25 = vor.u32 %v972_v20, %v863_v22  ;;  %v853_v26 = vld [vmem:[%s1312_s1 + $0xd0] sm:$0xf]  ;;  %v971_v27 = vld [vmem:[%s1312_s1 + $0xd4] sm:$0xf0]  ;;  %v954_v28 = vld [vmem:[%s1312_s1 + $0x54] sm:$0xf]  ;;  %v790_v29 = vor.u32 %v955_v24, %v789_v23 }
  0x12   : > { %442 = vmatpush.bf16.msra.mxu0 %v798_v16  ;;  %v791_v30 = vld [vmem:[%s1312_s1 + $0x58] sm:$0xf0]  ;;  %v970_v31 = vld [vmem:[%s1312_s1 + $0xd4] sm:$0xf]  ;;  %v854_v33 = vor.u32 %v971_v27, %v853_v26  ;;  %v781_v35 = vld [vmem:[%s1312_s1 + $0x40] sm:$0xf] }
  0x13   : > { %v855_v32 = vld [vmem:[%s1312_s1 + $0xd8] sm:$0xf0]  ;;  %456 = vmatpush.bf16.msra.mxu1 %v862_v17  ;;  %470 = vmatpush.bf16.msra.mxu2 %v802_v21  ;;  %v794_v34 = vor.u32 %v954_v28, %v791_v30  ;;  %v953_v36 = vld [vmem:[%s1312_s1 + $0x44] sm:$0xf0]  ;;  %v845_v37 = vld [vmem:[%s1312_s1 + $0xc0] sm:$0xf] }
  0x14   : > { %484 = vmatpush.bf16.msra.mxu3 %v866_v25  ;;  %v858_v38 = vor.u32 %v970_v31, %v855_v32  ;;  %v969_v39 = vld [vmem:[%s1312_s1 + $0xc4] sm:$0xf0]  ;;  %v952_v40 = vld [vmem:[%s1312_s1 + $0x44] sm:$0xf]  ;;  %v783_v41 = vld [vmem:[%s1312_s1 + $0x48] sm:$0xf0]  ;;  %v782_v44 = vor.u32 %v953_v36, %v781_v35 }
  0x15   : > { %v968_v42 = vld [vmem:[%s1312_s1 + $0xc4] sm:$0xf]  ;;  %v847_v43 = vld [vmem:[%s1312_s1 + $0xc8] sm:$0xf0]  ;;  %v846_v45 = vor.u32 %v969_v39, %v845_v37  ;;  %v786_v46 = vor.u32 %v952_v40, %v783_v41  ;;  %v773_v47 = vld [vmem:[%s1312_s1 + $0x30] sm:$0xf] }
  0x16   : > { %443 = vmatpush.bf16.msra.mxu0 %v790_v29  ;;  %v951_v48 = vld [vmem:[%s1312_s1 + $0x34] sm:$0xf0]  ;;  %v837_v49 = vld [vmem:[%s1312_s1 + $0xb0] sm:$0xf]  ;;  %v850_v50 = vor.u32 %v968_v42, %v847_v43  ;;  %v950_v52 = vld [vmem:[%s1312_s1 + $0x34] sm:$0xf] }
  0x17   : > { %457 = vmatpush.bf16.msra.mxu1 %v854_v33  ;;  %471 = vmatpush.bf16.msra.mxu2 %v794_v34  ;;  %v967_v51 = vld [vmem:[%s1312_s1 + $0xb4] sm:$0xf0]  ;;  %v775_v53 = vld [vmem:[%s1312_s1 + $0x38] sm:$0xf0]  ;;  %v966_v54 = vld [vmem:[%s1312_s1 + $0xb4] sm:$0xf]  ;;  %v774_v56 = vor.u32 %v951_v48, %v773_v47 }
  0x18   : > { %485 = vmatpush.bf16.msra.mxu3 %v858_v38  ;;  %v839_v55 = vld [vmem:[%s1312_s1 + $0xb8] sm:$0xf0]  ;;  %v838_v57 = vor.u32 %v967_v51, %v837_v49  ;;  %v778_v58 = vor.u32 %v950_v52, %v775_v53  ;;  %v765_v59 = vld [vmem:[%s1312_s1 + $0x20] sm:$0xf]  ;;  %v949_v60 = vld [vmem:[%s1312_s1 + $0x24] sm:$0xf0] }
  0x19   : > { %v829_v61 = vld [vmem:[%s1312_s1 + $0xa0] sm:$0xf]  ;;  %v842_v62 = vor.u32 %v966_v54, %v839_v55  ;;  %v965_v63 = vld [vmem:[%s1312_s1 + $0xa4] sm:$0xf0]  ;;  %v948_v0 = vld [vmem:[%s1312_s1 + $0x24] sm:$0xf]  ;;  %v766_v4 = vor.u32 %v949_v60, %v765_v59 }
  0x1a   : > { %444 = vmatpush.bf16.msra.mxu0 %v782_v44  ;;  %v767_v1 = vld [vmem:[%s1312_s1 + $0x28] sm:$0xf0]  ;;  %v964_v2 = vld [vmem:[%s1312_s1 + $0xa4] sm:$0xf]  ;;  %v757_v5 = vld [vmem:[%s1312_s1 + $0x10] sm:$0xf]  ;;  %v830_v6 = vor.u32 %v965_v63, %v829_v61 }
  0x1b   : > { %458 = vmatpush.bf16.msra.mxu1 %v846_v45  ;;  %472 = vmatpush.bf16.msra.mxu2 %v786_v46  ;;  %v831_v3 = vld [vmem:[%s1312_s1 + $0xa8] sm:$0xf0]  ;;  %v770_v7 = vor.u32 %v948_v0, %v767_v1  ;;  %v947_v8 = vld [vmem:[%s1312_s1 + $0x14] sm:$0xf0]  ;;  %v821_v9 = vld [vmem:[%s1312_s1 + $0x90] sm:$0xf] }
  0x1c   : > { %486 = vmatpush.bf16.msra.mxu3 %v850_v50  ;;  %v963_v10 = vld [vmem:[%s1312_s1 + $0x94] sm:$0xf0]  ;;  %v834_v11 = vor.u32 %v964_v2, %v831_v3  ;;  %v946_v12 = vld [vmem:[%s1312_s1 + $0x14] sm:$0xf]  ;;  %v759_v13 = vld [vmem:[%s1312_s1 + $0x18] sm:$0xf0]  ;;  %v758_v16 = vor.u32 %v947_v8, %v757_v5 }
  0x1d   : > { %v962_v14 = vld [vmem:[%s1312_s1 + $0x94] sm:$0xf]  ;;  %v823_v15 = vld [vmem:[%s1312_s1 + $0x98] sm:$0xf0]  ;;  %v749_v17 = vld [vmem:[%s1312_s1] sm:$0xf]  ;;  %v822_v18 = vor.u32 %v963_v10, %v821_v9  ;;  %v762_v19 = vor.u32 %v946_v12, %v759_v13 }
  0x1e   : > { %445 = vmatpush.bf16.msra.mxu0 %v774_v56  ;;  %v945_v20 = vld [vmem:[%s1312_s1 + $0x4] sm:$0xf0]  ;;  %v813_v21 = vld [vmem:[%s1312_s1 + $0x80] sm:$0xf]  ;;  %s1318_s11 = smov (!%p219_p3, %s734_s11), 3  ;;  %v826_v22 = vor.u32 %v962_v14, %v823_v15  ;;  %v983_v36 = vld [vmem:[%s1314_s3 + $0x38] sm:$0xff] }
  0x1f   : > { %459 = vmatpush.bf16.msra.mxu1 %v838_v57  ;;  %473 = vmatpush.bf16.msra.mxu2 %v778_v58  ;;  %v961_v23 = vld [vmem:[%s1312_s1 + $0x84] sm:$0xf0]  ;;  %v944_v24 = vld [vmem:[%s1312_s1 + $0x4] sm:$0xf]  ;;  %v751_v25 = vld [vmem:[%s1312_s1 + $0x8] sm:$0xf0]  ;;  %v750_v28 = vor.u32 %v945_v20, %v749_v17 }
  0x20   : > { %487 = vmatpush.bf16.msra.mxu3 %v842_v62  ;;  %v960_v26 = vld [vmem:[%s1312_s1 + $0x84] sm:$0xf]  ;;  %v815_v27 = vld [vmem:[%s1312_s1 + $0x88] sm:$0xf0]  ;;  %s941_s8 = sshll.u32 %s1318_s11, 3  ;;  %v814_v29 = vor.u32 %v961_v23, %v813_v21  ;;  %v754_v30 = vor.u32 %v944_v24, %v751_v25  ;;  %v991_v38 = vld [vmem:[%s1314_s3 + $0x78] sm:$0xff] }
  0x21   : > { %s223_s12 = scalar_lea.vmem %s1311_s0, %s941_s8  ;;  %v818_v34 = vor.u32 %v960_v26, %v815_v27  ;;  %v982_v40 = vld [vmem:[%s1314_s3 + $0x30] sm:$0xff]  ;;  %v981_v42 = vld [vmem:[%s1314_s3 + $0x28] sm:$0xff]  ;;  %v980_v43 = vld [vmem:[%s1314_s3 + $0x20] sm:$0xff]  ;;  %s229_s30 = scalar_lea.vmem %s1316_s5, %s941_s8 }
  0x22   : > { %446 = vmatpush.bf16.msra.mxu0 %v766_v4  ;;  %v741_v31 = vld [vmem:[%s223_s12] sm:$0xf]  ;;  %v943_v32 = vld [vmem:[%s223_s12 + $0x4] sm:$0xf0]  ;;  %v942_v33 = vld [vmem:[%s223_s12 + $0x4] sm:$0xf] }
  0x23   : > { %460 = vmatpush.bf16.msra.mxu1 %v830_v6  ;;  %474 = vmatpush.bf16.msra.mxu2 %v770_v7  ;;  %v743_v35 = vld [vmem:[%s223_s12 + $0x8] sm:$0xf0]  ;;  %v742_v37 = vor.u32 %v943_v32, %v741_v31  ;;  %v990_v41 = vld [vmem:[%s1314_s3 + $0x70] sm:$0xff]  ;;  %v979_v45 = vld [vmem:[%s1314_s3 + $0x18] sm:$0xff] }
  0x24   : > { %488 = vmatpush.bf16.msra.mxu3 %v834_v11  ;;  %v746_v39 = vor.u32 %v942_v33, %v743_v35  ;;  %v989_v44 = vld [vmem:[%s1314_s3 + $0x68] sm:$0xff]  ;;  %v988_v46 = vld [vmem:[%s1314_s3 + $0x60] sm:$0xff]  ;;  %v978_v47 = vld [vmem:[%s1314_s3 + $0x10] sm:$0xff] }
  0x25   : > { %v987_v48 = vld [vmem:[%s1314_s3 + $0x58] sm:$0xff]  ;;  %v977_v49 = vld [vmem:[%s1314_s3 + $0x8] sm:$0xff]  ;;  %v986_v50 = vld [vmem:[%s1314_s3 + $0x50] sm:$0xff] }
  0x26   : > { %447 = vmatpush.bf16.msra.mxu0 %v758_v16  ;;  %v976_v51 = vld [vmem:[%s1314_s3] sm:$0xff]  ;;  %v985_v52 = vld [vmem:[%s1314_s3 + $0x48] sm:$0xff] }
  0x27   : > { %461 = vmatpush.bf16.msra.mxu1 %v822_v18  ;;  %475 = vmatpush.bf16.msra.mxu2 %v762_v19  ;;  %v984_v53 = vld [vmem:[%s1314_s3 + $0x40] sm:$0xff] }
  0x28   : > { %489 = vmatpush.bf16.msra.mxu3 %v826_v22  ;;  %v265_v54 = vld [vmem:[%s1313_s2] sm:$0x3] }
  0x29   : > { %v267_v55 = vperm.slane %v265_v54, 0  ;;  %v268_v59 = vperm.slane %v265_v54, 1  ;;  %v1000_v20 = vld [vmem:[%s1315_s4] ss:$0 sm:$0xff] }
  0x2a   : > { %448 = vmatpush.bf16.msra.mxu0 %v750_v28 }
  0x2b   : > { %462 = vmatpush.bf16.msra.mxu1 %v814_v29  ;;  %476 = vmatpush.bf16.msra.mxu2 %v754_v30 }
  0x2c   : > { %490 = vmatpush.bf16.msra.mxu3 %v818_v34 }
  0x2d   : > { %449 = vmatmul.bf16.vlgmr.msra.gmra.mxu0 %v742_v37 }
  0x2e   : > { %643 = vmatpush.bf16.msrb.mxu0 %v983_v36  ;;  %463 = vmatmul.bf16.vlgmr.msra.gmra.mxu1 %v746_v39 }
  0x2f   : > { %657 = vmatpush.bf16.msrb.mxu1 %v991_v38  ;;  %477 = vmatmul.bf16.vlgmr.msra.gmra.mxu2 %v742_v37 }
  0x30   : > { %491 = vmatmul.bf16.vlgmr.msra.gmra.mxu3 %v746_v39 }
  0x32   : > { %644 = vmatpush.bf16.msrb.mxu0 %v982_v40 }
  0x33   : > { %658 = vmatpush.bf16.msrb.mxu1 %v990_v41 }
  0x36   : > { %645 = vmatpush.bf16.msrb.mxu0 %v981_v42 }
  0x37   : > { %659 = vmatpush.bf16.msrb.mxu1 %v989_v44 }
  0x3a   : > { %646 = vmatpush.bf16.msrb.mxu0 %v980_v43 }
  0x3b   : > { %660 = vmatpush.bf16.msrb.mxu1 %v988_v46 }
  0x3e   : > { %647 = vmatpush.bf16.msrb.mxu0 %v979_v45 }
  0x3f   : > { %661 = vmatpush.bf16.msrb.mxu1 %v987_v48 }
  0x42   : > { %648 = vmatpush.bf16.msrb.mxu0 %v978_v47 }
  0x43   : > { %662 = vmatpush.bf16.msrb.mxu1 %v986_v50 }
  0x46   : > { %649 = vmatpush.bf16.msrb.mxu0 %v977_v49 }
  0x47   : > { %663 = vmatpush.bf16.msrb.mxu1 %v985_v52 }
  0x4a   : > { %650 = vmatpush.bf16.msrb.mxu0 %v976_v51 }
  0x4b   : > { %664 = vmatpush.bf16.msrb.mxu1 %v984_v53 }
  0xaa   : > { %v450_v56 = vpop.f32.mrf.mxu0 }
  0xab   : > { %v464_v57 = vpop.f32.mrf.mxu1  ;;  %v451_v58 = vadd.f32 %v450_v56, %v267_v55 }
  0xad   : > { %v465_v60 = vadd.f32 %v464_v57, %v451_v58 }
  0xaf   : > { %v501_v3 = vmul.f32 0.01, %v465_v60  ;;  %vm497_vm0 = vcmp.gt.f32.partialorder %v465_v60, 0.0 }
  0xb1   : > { %v505_v8 = vsel %vm497_vm0, %v465_v60, %v501_v3 }
  0xb2   : > { %v478_v61 = vpop.f32.mrf.mxu2  ;;  %v452_v63 = vpop.f32.mrf.mxu0 }
  0xb3   : > { %v492_v62 = vpop.f32.mrf.mxu3  ;;  %v453_v0 = vadd.f32 %v452_v63, %v267_v55  ;;  %v479_v1 = vadd.f32 %v478_v61, %v268_v59  ;;  %v466_v2 = vpop.f32.mrf.mxu1 }
  0xb5   : > { %v467_v4 = vadd.f32 %v466_v2, %v453_v0  ;;  %v493_v6 = vadd.f32 %v492_v62, %v479_v1 }
  0xb7   : > { %vm499_vm1 = vcmp.gt.f32.partialorder %v467_v4, 0.0  ;;  %v503_v5 = vmul.f32 0.01, %v467_v4  ;;  %v502_v13 = vmul.f32 0.01, %v493_v6  ;;  %vm498_vm2 = vcmp.gt.f32.partialorder %v493_v6, 0.0 }
  0xb9   : > { %v507_v9 = vsel %vm499_vm1, %v467_v4, %v503_v5  ;;  %v506_v16 = vsel %vm498_vm2, %v493_v6, %v502_v13 }
  0xba   : > { %v480_v7 = vpop.f32.mrf.mxu2  ;;  %v509_v11 = vpack.c.bf16 %v507_v9, %v505_v8 }
  0xbb   : > { %v481_v10 = vadd.f32 %v480_v7, %v268_v59  ;;  %v494_v12 = vpop.f32.mrf.mxu3 }
  0xbc   : > { %651 = vmatmul.bf16.vlgmr.msrb.gmra.mxu0 %v509_v11 }
  0xbd   : > { %v495_v14 = vadd.f32 %v494_v12, %v481_v10 }
  0xbf   : > { %vm500_vm3 = vcmp.gt.f32.partialorder %v495_v14, 0.0  ;;  %v504_v15 = vmul.f32 0.01, %v495_v14 }
  0xc1   : > { %v508_v17 = vsel %vm500_vm3, %v495_v14, %v504_v15 }
  0xc2   : > { %v510_v18 = vpack.c.bf16 %v508_v17, %v506_v16 }
  0xc4   : > { %665 = vmatmul.bf16.vlgmr.msrb.gmra.mxu1 %v510_v18 }
 0x139   : > { %v652_v19 = vpop.f32.mrf.mxu0 }
 0x13a   : > { %v653_v21 = vadd.f32 %v1000_v20, %v652_v19 }
 0x141   : > { %v666_v22 = vpop.f32.mrf.mxu1  ;;  %v654_v24 = vpop.f32.mrf.mxu0 }
 0x142   : > { %v667_v23 = vadd.f32 %v666_v22, %v653_v21  ;;  %v655_v25 = vadd.f32 %v1000_v20, %v654_v24 }
 0x144   : > { %671 = vst [vmem:[%s229_s30] sm:$0xff] %v667_v23 }
 0x149   : > { %v668_v26 = vpop.f32.mrf.mxu1 }
 0x14a   : > { %v669_v27 = vadd.f32 %v668_v26, %v655_v25 }
 0x14c   : > { %672 = vst [vmem:[%s229_s30 + $0x8] sm:$0xff] %v669_v27 }
 0x14d PF: > { %s15_s18 = sadd.s32 1, %s1007_s18  }
 0x14e   : > { %p12_p4 = scmp.ge.s32.totalorder %s15_s18, 4  }
 0x150   :  { %14 = sbr.rel (!%p12_p4) target bundleno = 1 (0x1), region = 70 }

</bundles_post_ra>
